<compile_context>
chip_gen: v7x
topology: tpu7x:2x2x1
jax: 0.10.0
libtpu: 0.0.40
codegen_flags: <defaults>
</compile_context>

<pallas_src>
import jax
import jax.numpy as jnp
from jax.experimental import pallas as pl
from jax.experimental.pallas import tpu as pltpu

IN_FEATURES = 28 ** 2   # 784
NUM_HIDDENS = 200
NUM_CLASSES = 10

# Lane-dense (multiple-of-128) padded sizes used inside the kernel.
HID_PAD = 256           # 200 -> 256 (zero-padded; exact through ReLU)
CLS_PAD = 128           # 10  -> 128 for the MXU; only [:, :10] is stored


def _round_up(n, m):
    return (n + m - 1) // m * m


def dnn_kernel(x_ref, w1_ref, b1_ref, w2_ref, b2_ref, w3_ref, b3_ref, o_ref):
    # bf16 matmul operands on the MXU, f32 accumulation; elementwise bias+ReLU
    # in f32 (portable to v5e, which has no bf16 VPU). Kernel is HBM-bound on
    # the x read, so the extra f32 VALU work is free filler.
    x = x_ref[...].astype(jnp.bfloat16)
    h1 = jnp.dot(x, w1_ref[...], preferred_element_type=jnp.float32)
    h1 = jnp.maximum(h1 + b1_ref[...], 0.0).astype(jnp.bfloat16)
    h2 = jnp.dot(h1, w2_ref[...], preferred_element_type=jnp.float32)
    h2 = jnp.maximum(h2 + b2_ref[...], 0.0).astype(jnp.bfloat16)
    logits = jnp.dot(h2, w3_ref[...], preferred_element_type=jnp.float32) + b3_ref[...]
    # Store only the 10 real logit columns (output last dim == full array dim).
    o_ref[...] = logits[:, :NUM_CLASSES]


def _prepare_params(w1, b1, w2, b2, w3, b3):
    """Zero-pad params to lane-dense shapes; cast matmul operands to bf16."""
    def pad2(a, rows, cols):
        return jnp.pad(a, ((0, rows - a.shape[0]), (0, cols - a.shape[1])))

    w1p = pad2(w1, IN_FEATURES, HID_PAD).astype(jnp.bfloat16)
    w2p = pad2(w2, HID_PAD, HID_PAD).astype(jnp.bfloat16)
    w3p = pad2(w3, HID_PAD, CLS_PAD).astype(jnp.bfloat16)
    b1p = pad2(b1, 1, HID_PAD)   # biases stay f32 (added to f32 accumulator)
    b2p = pad2(b2, 1, HID_PAD)
    b3p = pad2(b3, 1, CLS_PAD)
    return w1p, b1p, w2p, b2p, w3p, b3p


def _default_tile_and_vmem():
    """Chip-aware defaults: bigger tiles where VMEM allows (v5e/v6e: 128 MiB)."""
    try:
        vmem_bytes = pltpu.get_tpu_info().vmem_capacity_bytes
    except Exception:
        vmem_bytes = 64 * 1024 * 1024          # conservative (v7x per-TC)
    if vmem_bytes >= 96 * 1024 * 1024:         # v5e / v6e
        return 4096, 96 * 1024 * 1024
    return 2048, 48 * 1024 * 1024              # v7x


def dnn_forward(x, w1, b1, w2, b2, w3, b3, *, block_b=None):
    """Forward pass of DNN: relu(x@w1+b1) -> relu(@w2+b2) -> @w3+b3 (f32 out).

    x may be f32 (module default) or bf16 (halves input HBM traffic if the
    producer already emits bf16); the in-kernel bf16 cast is a no-op then.
    """
    B = x.shape[0]
    default_tb, vmem_limit = _default_tile_and_vmem()
    if block_b is None:
        block_b = default_tb

    # Batch tile: aim for >= 2 grid blocks (v7x megacore), multiple of 16 for
    # clean bf16 sublane packing, and never larger than the (rounded) batch.
    TB = max(16, _round_up(pl.cdiv(B, 2), 16))
    TB = min(TB, block_b, _round_up(B, 8))
    TB = _round_up(TB, 8)
    n_blocks = pl.cdiv(B, TB)   # ragged final block handled by Pallas; no x pad

    w1p, b1p, w2p, b2p, w3p, b3p = _prepare_params(w1, b1, w2, b2, w3, b3)

    # Weights/biases: constant index_map -> DMA'd once, VMEM-resident.
    const = lambda shape: pl.BlockSpec(shape, lambda i: (0, 0))

    flops = 2 * B * (IN_FEATURES * HID_PAD + HID_PAD * HID_PAD + HID_PAD * CLS_PAD)
    bytes_accessed = (
        B * IN_FEATURES * x.dtype.itemsize                     # x
        + B * NUM_CLASSES * 4                                   # output (10 cols)
        + 2 * (IN_FEATURES * HID_PAD + HID_PAD * HID_PAD + HID_PAD * CLS_PAD)  # bf16 W
        + 4 * (2 * HID_PAD + CLS_PAD)                           # f32 biases
    )

    out = pl.pallas_call(
        dnn_kernel,
        out_shape=jax.ShapeDtypeStruct((B, NUM_CLASSES), jnp.float32),
        grid=(n_blocks,),
        in_specs=[
            pl.BlockSpec((TB, IN_FEATURES), lambda i: (i, 0)),   # x tiles
            const(w1p.shape), const(b1p.shape),
            const(w2p.shape), const(b2p.shape),
            const(w3p.shape), const(b3p.shape),
        ],
        out_specs=pl.BlockSpec((TB, NUM_CLASSES), lambda i: (i, 0)),
        compiler_params=pltpu.CompilerParams(
            dimension_semantics=("parallel",),
            vmem_limit_bytes=vmem_limit,
        ),
        cost_estimate=pl.CostEstimate(
            flops=flops, transcendentals=0, bytes_accessed=bytes_accessed),
    )(x, w1p, b1p, w2p, b2p, w3p, b3p)

    return out


def init_params(key):
    """Deterministic init mimicking PyTorch Linear default (uniform ±1/sqrt(fan_in)).

    Weights are stored as [in_features, out_features] (transpose of PyTorch's
    [out, in]) so the kernel computes y = x @ W + b directly on the MXU.
    """
    ks = jax.random.split(key, 6)

    def linear(kw, kb, fan_in, fan_out):
        bound = 1.0 / jnp.sqrt(jnp.float32(fan_in))
        w = jax.random.uniform(kw, (fan_in, fan_out), jnp.float32, -bound, bound)
        b = jax.random.uniform(kb, (1, fan_out), jnp.float32, -bound, bound)
        return w, b

    w1, b1 = linear(ks[0], ks[1], IN_FEATURES, NUM_HIDDENS)
    w2, b2 = linear(ks[2], ks[3], NUM_HIDDENS, NUM_HIDDENS)
    w3, b3 = linear(ks[4], ks[5], NUM_HIDDENS, NUM_CLASSES)
    return w1, b1, w2, b2, w3, b3


if __name__ == "__main__":
    key = jax.random.PRNGKey(0)
    k_params, k_x = jax.random.split(key)
    params = init_params(k_params)
    w1, b1, w2, b2, w3, b3 = params

    def ref_forward(xx):
        h = jnp.maximum(xx @ w1 + b1, 0.0)
        h = jnp.maximum(h @ w2 + b2, 0.0)
        return h @ w3 + b3

    # Small demo batch (single grid tile).
    batch = 8
    x_small = jax.random.normal(k_x, (batch, IN_FEATURES), dtype=jnp.float32)
    out_small = jax.block_until_ready(dnn_forward(x_small, *params))
    assert out_small.shape == (batch, NUM_CLASSES)
    # bf16 matmul operands (f32 accumulation) -> relaxed tolerance vs f32 ref.
    assert jnp.allclose(out_small, ref_forward(x_small), atol=3e-2, rtol=3e-2)

    # Non-multiple batch with several grid tiles (exercises the ragged final
    # block, auto-pipelining and the narrow 10-column output store).
    x_big = jax.random.normal(jax.random.PRNGKey(1), (300, IN_FEATURES),
                              dtype=jnp.float32)
    out_big = jax.block_until_ready(dnn_forward(x_big, *params, block_b=128))
    assert out_big.shape == (300, NUM_CLASSES)
    assert jnp.allclose(out_big, ref_forward(x_big), atol=3e-2, rtol=3e-2)

    print("KERNEL_OK")
</pallas_src>

<mosaic_0001>
module attributes {stable_mosaic.version = 11 : i64} {
  func.func @dnn_kernel(%arg0: i32, %arg1: memref<8x784xf32, #tpu.memory_space<vmem>>, %arg2: memref<784x256xbf16, #tpu.memory_space<vmem>>, %arg3: memref<1x256xf32, #tpu.memory_space<vmem>>, %arg4: memref<256x256xbf16, #tpu.memory_space<vmem>>, %arg5: memref<1x256xf32, #tpu.memory_space<vmem>>, %arg6: memref<256x128xbf16, #tpu.memory_space<vmem>>, %arg7: memref<1x128xf32, #tpu.memory_space<vmem>>, %arg8: memref<8x10xf32, #tpu.memory_space<vmem>>) attributes {dimension_semantics = [#tpu.dimension_semantics<parallel>], iteration_bounds = array<i64: 1>, scalar_prefetch = 0 : i64, scratch_operands = 0 : i64, tpu.core_type = #tpu.core_type<tc>, window_params = [{transform_indices = @transform_0, window_bounds = array<i64: 8, 784>}, {pipeline_mode = #tpu.pipeline_mode<synchronous>, transform_indices = @transform_1, window_bounds = array<i64: 784, 256>}, {pipeline_mode = #tpu.pipeline_mode<synchronous>, transform_indices = @transform_2, window_bounds = array<i64: 1, 256>}, {pipeline_mode = #tpu.pipeline_mode<synchronous>, transform_indices = @transform_3, window_bounds = array<i64: 256, 256>}, {pipeline_mode = #tpu.pipeline_mode<synchronous>, transform_indices = @transform_4, window_bounds = array<i64: 1, 256>}, {pipeline_mode = #tpu.pipeline_mode<synchronous>, transform_indices = @transform_5, window_bounds = array<i64: 256, 128>}, {pipeline_mode = #tpu.pipeline_mode<synchronous>, transform_indices = @transform_6, window_bounds = array<i64: 1, 128>}, {transform_indices = @transform_7, window_bounds = array<i64: 8, 10>}]} {
    %c0 = arith.constant 0 : index
    %c0_0 = arith.constant 0 : index
    %0 = vector.load %arg1[%c0, %c0_0] : memref<8x784xf32, #tpu.memory_space<vmem>>, vector<8x784xf32>
    %1 = arith.truncf %0 : vector<8x784xf32> to vector<8x784xbf16>
    %c0_1 = arith.constant 0 : index
    %c0_2 = arith.constant 0 : index
    %2 = vector.load %arg2[%c0_1, %c0_2] : memref<784x256xbf16, #tpu.memory_space<vmem>>, vector<784x256xbf16>
    %cst = arith.constant dense<0.000000e+00> : vector<8x256xf32>
    %3 = tpu.matmul %1, %2, %cst {dimension_numbers = #tpu.dot_dimension_numbers<[1], [0], [0], [1], [0, 0, 1, 1], [], []>} : vector<8x784xbf16>, vector<784x256xbf16>, vector<8x256xf32> -> vector<8x256xf32>
    %c0_3 = arith.constant 0 : index
    %c0_4 = arith.constant 0 : index
    %4 = vector.load %arg3[%c0_3, %c0_4] : memref<1x256xf32, #tpu.memory_space<vmem>>, vector<1x256xf32>
    %5 = vector.broadcast %4 : vector<1x256xf32> to vector<8x256xf32>
    %6 = arith.addf %3, %5 : vector<8x256xf32>
    %cst_5 = arith.constant 0.000000e+00 : f32
    %7 = vector.broadcast %cst_5 : f32 to vector<8x256xf32>
    %8 = arith.maximumf %6, %7 : vector<8x256xf32>
    %9 = arith.truncf %8 : vector<8x256xf32> to vector<8x256xbf16>
    %c0_6 = arith.constant 0 : index
    %c0_7 = arith.constant 0 : index
    %10 = vector.load %arg4[%c0_6, %c0_7] : memref<256x256xbf16, #tpu.memory_space<vmem>>, vector<256x256xbf16>
    %cst_8 = arith.constant dense<0.000000e+00> : vector<8x256xf32>
    %11 = tpu.matmul %9, %10, %cst_8 {dimension_numbers = #tpu.dot_dimension_numbers<[1], [0], [0], [1], [0, 0, 1, 1], [], []>} : vector<8x256xbf16>, vector<256x256xbf16>, vector<8x256xf32> -> vector<8x256xf32>
    %c0_9 = arith.constant 0 : index
    %c0_10 = arith.constant 0 : index
    %12 = vector.load %arg5[%c0_9, %c0_10] : memref<1x256xf32, #tpu.memory_space<vmem>>, vector<1x256xf32>
    %13 = vector.broadcast %12 : vector<1x256xf32> to vector<8x256xf32>
    %14 = arith.addf %11, %13 : vector<8x256xf32>
    %cst_11 = arith.constant 0.000000e+00 : f32
    %15 = vector.broadcast %cst_11 : f32 to vector<8x256xf32>
    %16 = arith.maximumf %14, %15 : vector<8x256xf32>
    %17 = arith.truncf %16 : vector<8x256xf32> to vector<8x256xbf16>
    %c0_12 = arith.constant 0 : index
    %c0_13 = arith.constant 0 : index
    %18 = vector.load %arg6[%c0_12, %c0_13] : memref<256x128xbf16, #tpu.memory_space<vmem>>, vector<256x128xbf16>
    %cst_14 = arith.constant dense<0.000000e+00> : vector<8x128xf32>
    %19 = tpu.matmul %17, %18, %cst_14 {dimension_numbers = #tpu.dot_dimension_numbers<[1], [0], [0], [1], [0, 0, 1, 1], [], []>} : vector<8x256xbf16>, vector<256x128xbf16>, vector<8x128xf32> -> vector<8x128xf32>
    %c0_15 = arith.constant 0 : index
    %c0_16 = arith.constant 0 : index
    %20 = vector.load %arg7[%c0_15, %c0_16] : memref<1x128xf32, #tpu.memory_space<vmem>>, vector<1x128xf32>
    %21 = vector.broadcast %20 : vector<1x128xf32> to vector<8x128xf32>
    %22 = arith.addf %19, %21 : vector<8x128xf32>
    %23 = vector.extract_strided_slice %22 {offsets = [0, 0], sizes = [8, 10], strides = [1, 1]} : vector<8x128xf32> to vector<8x10xf32>
    %c0_17 = arith.constant 0 : index
    %c0_18 = arith.constant 0 : index
    %24 = vector.load %arg8[%c0_17, %c0_18] : memref<8x10xf32, #tpu.memory_space<vmem>>, vector<8x10xf32>
    tpu.vector_store %arg8[%c0_17, %c0_18], %23 {strides = array<i32>} : memref<8x10xf32, #tpu.memory_space<vmem>>, vector<8x10xf32>,
    return
  }
  func.func @transform_0(%arg0: i32) -> (i32, i32) {
    %c0_i32 = arith.constant 0 : i32
    %c0_i32_0 = arith.constant 0 : i32
    return %arg0, %c0_i32 : i32, i32
  }
  func.func @transform_1(%arg0: i32) -> (i32, i32) {
    %c0_i32 = arith.constant 0 : i32
    %c0_i32_0 = arith.constant 0 : i32
    %c0_i32_1 = arith.constant 0 : i32
    return %c0_i32, %c0_i32_0 : i32, i32
  }
  func.func @transform_2(%arg0: i32) -> (i32, i32) {
    %c0_i32 = arith.constant 0 : i32
    %c0_i32_0 = arith.constant 0 : i32
    %c0_i32_1 = arith.constant 0 : i32
    return %c0_i32, %c0_i32_0 : i32, i32
  }
  func.func @transform_3(%arg0: i32) -> (i32, i32) {
    %c0_i32 = arith.constant 0 : i32
    %c0_i32_0 = arith.constant 0 : i32
    %c0_i32_1 = arith.constant 0 : i32
    return %c0_i32, %c0_i32_0 : i32, i32
  }
  func.func @transform_4(%arg0: i32) -> (i32, i32) {
    %c0_i32 = arith.constant 0 : i32
    %c0_i32_0 = arith.constant 0 : i32
    %c0_i32_1 = arith.constant 0 : i32
    return %c0_i32, %c0_i32_0 : i32, i32
  }
  func.func @transform_5(%arg0: i32) -> (i32, i32) {
    %c0_i32 = arith.constant 0 : i32
    %c0_i32_0 = arith.constant 0 : i32
    %c0_i32_1 = arith.constant 0 : i32
    return %c0_i32, %c0_i32_0 : i32, i32
  }
  func.func @transform_6(%arg0: i32) -> (i32, i32) {
    %c0_i32 = arith.constant 0 : i32
    %c0_i32_0 = arith.constant 0 : i32
    %c0_i32_1 = arith.constant 0 : i32
    return %c0_i32, %c0_i32_0 : i32, i32
  }
  func.func @transform_7(%arg0: i32) -> (i32, i32) {
    %c0_i32 = arith.constant 0 : i32
    %c0_i32_0 = arith.constant 0 : i32
    return %arg0, %c0_i32 : i32, i32
  }
}

</mosaic_0001>

<bundles_post_ra>
// kernel: tpu_custom_call.1
= control target key start
LH: loop header
LB: loop body
LE: loop exit
PB: predicated region body
PF: predicated region fallthrough
CT: control target
= control target key end

     0   :  { %12 = vsyncpa [#allocation3], 0  ;;  %s1956_s0 = inlined_call_operand.hbm [shape: f32[8,784], index: 0, kind: input, shape index: {}]   ;;  %s1957_s1 = inlined_call_operand.hbm [shape: bf16[784,256], index: 1, kind: input, shape index: {}]   ;;  %s1958_s2 = inlined_call_operand.vmem [shape: f32[1,256], index: 2, kind: input, shape index: {}]   ;;  %s1959_s3 = inlined_call_operand.hbm [shape: bf16[256,256], index: 3, kind: input, shape index: {}]   ;;  %s1960_s4 = inlined_call_operand.vmem [shape: f32[1,256], index: 4, kind: input, shape index: {}]   ;;  %s1961_s5 = inlined_call_operand.hbm [shape: bf16[256,128], index: 5, kind: input, shape index: {}]   ;;  %s1962_s6 = inlined_call_operand.vmem [shape: f32[1,128], index: 6, kind: input, shape index: {}]   ;;  %s1963_s7 = inlined_call_operand.hbm [shape: f32[8,10], index: 7, kind: output, shape index: {}]  }
   0x1   :  { %13 = vsyncpa [#allocation6], 0 }
   0x2   :  { %14 = vsyncpa [#allocation9], 0 }
   0x3   :  { %15 = vsyncpa [#allocation4], 0  ;;  %s1831_s24 = smov [#allocation5]   ;;  %s1713_s28 = scalar_lea.hbm %s1957_s1, 12544 }
   0x4   :  { %s31_s25 = sshll.u32 %s1831_s24, 4  ;;  %p1714_p0 = scmp.ne.s32.totalorder %s1957_s1, %s1713_s28  ;;  %s32_s25 = int_to_ptr.vmem [resolvable:$true] %s31_s25 }
   0x5   :  { %p1717_p1 = scmp.lt.u32.totalorder %s1713_s28, %s1957_s1 }
   0x7   :  { %p1719_p2 = pnand %p1717_p1, %p1714_p0 }
   0x9   :  { %1722 = shalt.err (!%p1719_p2)
}
   0xa   :  { %s1723_s10 = scalar_lea.vmem %s32_s25, 12544  ;;  %p1728_p4 = scmp.lt.s32.totalorder %s32_s25, %s32_s25 }
   0xb   :  { %p1724_p3 = scmp.ne.s32.totalorder %s32_s25, %s1723_s10  ;;  %p1729_p5 = scmp.lt.s32.totalorder %s1723_s10, %s1723_s10 }
   0xd   :  { %p1730_p6 = por %p1729_p5, %p1728_p4 }
   0xf   :  { %p1731_p7 = pnand %p1730_p6, %p1724_p3 }
  0x11   :  { %1734 = shalt.err (!%p1731_p7)
}
  0x12   :  { %s1832_s11 = smov 128   ;;  %s1833_s12 = smov 8  }
  0x13   :  { %37 = dma.hbm_to_vmem [thread:$0]  %s1957_s1, 12544, %s32_s25, [#allocation6], %s1832_s11, %s1832_s11, %s1833_s12  }
  0x14   :  { %s1834_s15 = smov [#allocation2]   ;;  %s1835_s17 = smov [#allocation7]  }
  0x15   :  { %s22_s16 = sshll.u32 %s1834_s15, 4  ;;  %s45_s18 = sshll.u32 %s1835_s17, 4  ;;  %s23_s16 = int_to_ptr.vmem [resolvable:$true] %s22_s16  ;;  %s46_s18 = int_to_ptr.vmem [resolvable:$true] %s45_s18 }
  0x16   :  { %s1735_s21 = scalar_lea.hbm %s1956_s0, 896 }
  0x17   :  { %p1736_p8 = scmp.ne.s32.totalorder %s1956_s0, %s1735_s21  ;;  %p1739_p9 = scmp.lt.u32.totalorder %s1735_s21, %s1956_s0 }
  0x19   :  { %p1741_p10 = pnand %p1739_p9, %p1736_p8 }
  0x1b   :  { %1744 = shalt.err (!%p1741_p10)
}
  0x1c   :  { %s1745_s1 = scalar_lea.vmem %s23_s16, 896  ;;  %p1750_p12 = scmp.lt.s32.totalorder %s23_s16, %s23_s16 }
  0x1d   :  { %p1746_p11 = scmp.ne.s32.totalorder %s23_s16, %s1745_s1  ;;  %p1751_p13 = scmp.lt.s32.totalorder %s1745_s1, %s1745_s1 }
  0x1f   :  { %p1752_p0 = por %p1751_p13, %p1750_p12 }
  0x21   :  { %p1753_p1 = pnand %p1752_p0, %p1746_p11 }
  0x23   :  { %1756 = shalt.err (!%p1753_p1)
}
  0x24   :  { %25 = dma.hbm_to_vmem [thread:$0]  %s1956_s0, 896, %s23_s16, [#allocation3]  }
  0x25   :  { %s1757_s30 = scalar_lea.hbm %s1959_s3, 4096 }
  0x26   :  { %p1758_p2 = scmp.ne.s32.totalorder %s1959_s3, %s1757_s30  ;;  %p1761_p3 = scmp.lt.u32.totalorder %s1757_s30, %s1959_s3 }
  0x28   :  { %p1763_p4 = pnand %p1761_p3, %p1758_p2 }
  0x2a   :  { %1766 = shalt.err (!%p1763_p4)
}
  0x2b   :  { %s1767_s14 = scalar_lea.vmem %s46_s18, 4096  ;;  %p1772_p6 = scmp.lt.s32.totalorder %s46_s18, %s46_s18 }
  0x2c   :  { %p1768_p5 = scmp.ne.s32.totalorder %s46_s18, %s1767_s14  ;;  %p1773_p7 = scmp.lt.s32.totalorder %s1767_s14, %s1767_s14 }
  0x2e   :  { %p1774_p8 = por %p1773_p7, %p1772_p6 }
  0x30   :  { %p1775_p9 = pnand %p1774_p8, %p1768_p5 }
  0x32   :  { %1778 = shalt.err (!%p1775_p9)
}
  0x33   :  { %51 = dma.hbm_to_vmem [thread:$0]  %s1959_s3, 4096, %s46_s18, [#allocation6], %s1832_s11, %s1832_s11, %s1833_s12  }
  0x34   :  { %s1836_s16 = smov [#allocation8]   ;;  %s1779_s21 = scalar_lea.hbm %s1961_s5, 2048 }
  0x35   :  { %s59_s17 = sshll.u32 %s1836_s16, 4  ;;  %p1780_p10 = scmp.ne.s32.totalorder %s1961_s5, %s1779_s21  ;;  %s60_s17 = int_to_ptr.vmem [resolvable:$true] %s59_s17 }
  0x36   :  { %p1783_p11 = scmp.lt.u32.totalorder %s1779_s21, %s1961_s5 }
  0x38   :  { %p1785_p12 = pnand %p1783_p11, %p1780_p10 }
  0x3a   :  { %1788 = shalt.err (!%p1785_p12)
}
  0x3b   :  { %s1789_s1 = scalar_lea.vmem %s60_s17, 2048  ;;  %p1794_p0 = scmp.lt.s32.totalorder %s60_s17, %s60_s17 }
  0x3c   :  { %p1790_p13 = scmp.ne.s32.totalorder %s60_s17, %s1789_s1  ;;  %p1795_p1 = scmp.lt.s32.totalorder %s1789_s1, %s1789_s1 }
  0x3e   :  { %p1796_p2 = por %p1795_p1, %p1794_p0 }
  0x40   :  { %p1797_p3 = pnand %p1796_p2, %p1790_p13 }
  0x42   :  { %1800 = shalt.err (!%p1797_p3)
}
  0x43   :  { %s1837_s3 = smov 64   ;;  %s1838_s11 = smov 4  }
  0x44   :  { %65 = dma.hbm_to_vmem [thread:$0]  %s1961_s5, 2048, %s60_s17, [#allocation9], %s1837_s3, %s1837_s3, %s1838_s11  }
  0x45   :  { %1823 = dma.done.wait [#allocation3], 896  }
  0x46   :  { %1824 = vsyncadd [#allocation3], 4294966400 }
  0x47   :  { %1825 = dma.done.wait [#allocation6], 16640  }
  0x48   :  { %1826 = vsyncadd [#allocation6], 4294950656 }
  0x49   :  { %1827 = dma.done.wait [#allocation9], 2048  }
  0x4a   :  { %1828 = vsyncadd [#allocation9], 4294965248  ;;  %v1502_v0 = vld [vmem:[#allocation5 + $0x104] ss:$8 sps:$4 sm:$0xff]   ;;  %v1504_v1 = vld [vmem:[#allocation5 + $0x100] ss:$8 sps:$4 sm:$0xff]  }
  0x4b   :  { %740 = vmatprep.subr.bf16.mxu0 %v1502_v0  ;;  %v1505_v2 = vld [vmem:[#allocation5 + $0x114] ss:$8 sps:$4 sm:$0xff]   ;;  %v1507_v3 = vld [vmem:[#allocation5 + $0x110] ss:$8 sps:$4 sm:$0xff]   ;;  %v1508_v4 = vld [vmem:[#allocation5 + $0x124] ss:$8 sps:$4 sm:$0xff]  }
  0x4c   :  { %741 = vmatpush1.bf16.msra.mxu0 %v1504_v1  ;;  %v1510_v5 = vld [vmem:[#allocation5 + $0x120] ss:$8 sps:$4 sm:$0xff]   ;;  %v1511_v6 = vld [vmem:[#allocation5 + $0x134] ss:$8 sps:$4 sm:$0xff]   ;;  %v1513_v7 = vld [vmem:[#allocation5 + $0x130] ss:$8 sps:$4 sm:$0xff]  }
  0x4d   :  { %742 = vmatprep.subr.bf16.mxu0 %v1505_v2  ;;  %v1514_v8 = vld [vmem:[#allocation5 + $0x144] ss:$8 sps:$4 sm:$0xff]   ;;  %v1516_v9 = vld [vmem:[#allocation5 + $0x140] ss:$8 sps:$4 sm:$0xff]   ;;  %v1517_v10 = vld [vmem:[#allocation5 + $0x154] ss:$8 sps:$4 sm:$0xff]  }
  0x4e   :  { %v1519_v11 = vld [vmem:[#allocation5 + $0x150] ss:$8 sps:$4 sm:$0xff]   ;;  %v1520_v12 = vld [vmem:[#allocation5 + $0x164] ss:$8 sps:$4 sm:$0xff]   ;;  %v1522_v15 = vld [vmem:[#allocation5 + $0x160] ss:$8 sps:$4 sm:$0xff]  }
  0x4f   :  { %v84_v13 = vld [vmem:[#allocation2 + $0x18] sm:$0xff]  ;;  %v1523_v16 = vld [vmem:[#allocation5 + $0x174] ss:$8 sps:$4 sm:$0xff]   ;;  %v1525_v18 = vld [vmem:[#allocation5 + $0x170] ss:$8 sps:$4 sm:$0xff]   ;;  %vm695_vm0 = vcmask 130048  }
  0x50   :  { %743 = vmatpush1.bf16.msra.mxu0 %v1507_v3  ;;  %v91_v14 = vpack.c.bf16 %v84_v13, %v84_v13  ;;  %v1556_v17 = vld [vmem:[#allocation5 + $0x4] ss:$8 sps:$4 sm:$0xff]   ;;  %v1561_v20 = vld [vmem:[#allocation5] ss:$8 sps:$4 sm:$0xff]   ;;  %v1562_v21 = vld [vmem:[#allocation5 + $0x14] ss:$8 sps:$4 sm:$0xff]  }
  0x51   :  { %744 = vmatprep.subr.bf16.mxu0 %v1508_v4  ;;  %v1526_v19 = vld [vmem:[#allocation5 + $0x184] ss:$8 sps:$4 sm:$0xff]   ;;  %699 = vmatprep.subr.bf16.mxu1 %v1556_v17  ;;  %v1567_v22 = vld [vmem:[#allocation5 + $0x10] ss:$8 sps:$4 sm:$0xff]   ;;  %v1528_v24 = vld [vmem:[#allocation5 + $0x180] ss:$8 sps:$4 sm:$0xff]  }
  0x52   :  { %772 = vmatprep.mubr.bf16.mxu0 %v91_v14  ;;  %700 = vmatpush1.bf16.msra.mxu1 %v1561_v20  ;;  %v1568_v23 = vld [vmem:[#allocation5 + $0x24] ss:$8 sps:$4 sm:$0xff]   ;;  %v1529_v25 = vld [vmem:[#allocation5 + $0x194] ss:$8 sps:$4 sm:$0xff]   ;;  %v1573_v26 = vld [vmem:[#allocation5 + $0x20] ss:$8 sps:$4 sm:$0xff]  }
  0x53   :  { %701 = vmatprep.subr.bf16.mxu1 %v1562_v21  ;;  %v1574_v27 = vld [vmem:[#allocation5 + $0x34] ss:$8 sps:$4 sm:$0xff]   ;;  %v1531_v28 = vld [vmem:[#allocation5 + $0x190] ss:$8 sps:$4 sm:$0xff]   ;;  %v1532_v29 = vld [vmem:[#allocation5 + $0x1a4] ss:$8 sps:$4 sm:$0xff]  }
  0x54   :  { %745 = vmatpush1.bf16.msra.mxu0 %v1510_v5  ;;  %v1579_v30 = vld [vmem:[#allocation5 + $0x30] ss:$8 sps:$4 sm:$0xff]   ;;  %v1580_v31 = vld [vmem:[#allocation5 + $0x44] ss:$8 sps:$4 sm:$0xff]   ;;  %v1534_v32 = vld [vmem:[#allocation5 + $0x1a0] ss:$8 sps:$4 sm:$0xff]  }
  0x55   :  { %746 = vmatprep.subr.bf16.mxu0 %v1511_v6  ;;  %v1535_v33 = vld [vmem:[#allocation5 + $0x1b4] ss:$8 sps:$4 sm:$0xff]   ;;  %v1585_v34 = vld [vmem:[#allocation5 + $0x40] ss:$8 sps:$4 sm:$0xff]   ;;  %v1537_v36 = vld [vmem:[#allocation5 + $0x1b0] ss:$8 sps:$4 sm:$0xff]  }
  0x56   :  { %702 = vmatpush1.bf16.msra.mxu1 %v1567_v22  ;;  %v1586_v35 = vld [vmem:[#allocation5 + $0x54] ss:$8 sps:$4 sm:$0xff]   ;;  %v1538_v37 = vld [vmem:[#allocation5 + $0x1c4] ss:$8 sps:$4 sm:$0xff]   ;;  %v1591_v38 = vld [vmem:[#allocation5 + $0x50] ss:$8 sps:$4 sm:$0xff]  }
  0x57   :  { %703 = vmatprep.subr.bf16.mxu1 %v1568_v23  ;;  %v1592_v39 = vld [vmem:[#allocation5 + $0x64] ss:$8 sps:$4 sm:$0xff]   ;;  %v1540_v40 = vld [vmem:[#allocation5 + $0x1c0] ss:$8 sps:$4 sm:$0xff]   ;;  %v1541_v41 = vld [vmem:[#allocation5 + $0x1d4] ss:$8 sps:$4 sm:$0xff]  }
  0x58   :  { %747 = vmatpush1.bf16.msra.mxu0 %v1513_v7  ;;  %v1597_v42 = vld [vmem:[#allocation5 + $0x60] ss:$8 sps:$4 sm:$0xff]   ;;  %v1598_v43 = vld [vmem:[#allocation5 + $0x74] ss:$8 sps:$4 sm:$0xff]   ;;  %v1543_v44 = vld [vmem:[#allocation5 + $0x1d0] ss:$8 sps:$4 sm:$0xff]  }
  0x59   :  { %748 = vmatprep.subr.bf16.mxu0 %v1514_v8  ;;  %v1544_v45 = vld [vmem:[#allocation5 + $0x1e4] ss:$8 sps:$4 sm:$0xff]   ;;  %v1603_v46 = vld [vmem:[#allocation5 + $0x70] ss:$8 sps:$4 sm:$0xff]   ;;  %v1546_v48 = vld [vmem:[#allocation5 + $0x1e0] ss:$8 sps:$4 sm:$0xff]  }
  0x5a   :  { %704 = vmatpush1.bf16.msra.mxu1 %v1573_v26  ;;  %v1604_v47 = vld [vmem:[#allocation5 + $0x84] ss:$8 sps:$4 sm:$0xff]   ;;  %v1547_v49 = vld [vmem:[#allocation5 + $0x1f4] ss:$8 sps:$4 sm:$0xff]   ;;  %v1609_v50 = vld [vmem:[#allocation5 + $0x80] ss:$8 sps:$4 sm:$0xff]  }
  0x5b   :  { %705 = vmatprep.subr.bf16.mxu1 %v1574_v27  ;;  %v1549_v51 = vld [vmem:[#allocation5 + $0x1f0] ss:$8 sps:$4 sm:$0xff]   ;;  %v1610_v52 = vld [vmem:[#allocation5 + $0x94] ss:$8 sps:$4 sm:$0xff]   ;;  %v1552_v54 = vld [vmem:[#allocation5 + $0x204] ss:$8 sps:$4 sm:$0xff]  }
  0x5c   :  { %749 = vmatpush1.bf16.msra.mxu0 %v1516_v9  ;;  %v83_v53 = vld [vmem:[#allocation2 + $0x10] sm:$0xff]  ;;  %v1616_v56 = vld [vmem:[#allocation5 + $0xa4] ss:$8 sps:$4 sm:$0xff]   ;;  %v86_v58 = vld [vmem:[#allocation2 + $0x28] sm:$0xff]  ;;  %vm1291_vm1 = vcmask 80896  }
  0x5d   :  { %750 = vmatprep.subr.bf16.mxu0 %v1517_v10  ;;  %v1615_v55 = vld [vmem:[#allocation5 + $0x90] ss:$8 sps:$4 sm:$0xff]   ;;  %v90_v57 = vpack.c.bf16 %v83_v53, %v83_v53  ;;  %v1550_v59 = vld [vmem:[#allocation5 + $0x200] ss:$8 sps:$4 sm:$0xff]   ;;  %v93_v60 = vpack.c.bf16 %v86_v58, %v86_v58  ;;  %v1555_v61 = vld [vmem:[#allocation5 + $0x214] ss:$8 sps:$4 sm:$0xff]  }
  0x5e   :  { %706 = vmatpush1.bf16.msra.mxu1 %v1579_v30  ;;  %v1621_v62 = vld [vmem:[#allocation5 + $0xa0] ss:$8 sps:$4 sm:$0xff]   ;;  %v1622_v63 = vld [vmem:[#allocation5 + $0xb4] ss:$8 sps:$4 sm:$0xff]   ;;  %v1553_v1 = vld [vmem:[#allocation5 + $0x210] ss:$8 sps:$4 sm:$0xff]  }
  0x5f   :  { %707 = vmatprep.subr.bf16.mxu1 %v1580_v31  ;;  %v82_v0 = vld [vmem:[#allocation2 + $0x8] sm:$0xff]  ;;  %v1560_v3 = vld [vmem:[#allocation5 + $0x224] ss:$8 sps:$4 sm:$0xff]   ;;  %v1558_v6 = vld [vmem:[#allocation5 + $0x220] ss:$8 sps:$4 sm:$0xff]  }
  0x60   :  { %751 = vmatpush1.bf16.msra.mxu0 %v1519_v11  ;;  %v89_v2 = vpack.c.bf16 %v82_v0, %v82_v0  ;;  %v1627_v4 = vld [vmem:[#allocation5 + $0xb0] ss:$8 sps:$4 sm:$0xff]   ;;  %v1628_v5 = vld [vmem:[#allocation5 + $0xc4] ss:$8 sps:$4 sm:$0xff]   ;;  %v1566_v7 = vld [vmem:[#allocation5 + $0x234] ss:$8 sps:$4 sm:$0xff]  }
  0x61   :  { %752 = vmatprep.subr.bf16.mxu0 %v1520_v12  ;;  %v1633_v8 = vld [vmem:[#allocation5 + $0xc0] ss:$8 sps:$4 sm:$0xff]   ;;  %v1634_v9 = vld [vmem:[#allocation5 + $0xd4] ss:$8 sps:$4 sm:$0xff]   ;;  %v1564_v10 = vld [vmem:[#allocation5 + $0x230] ss:$8 sps:$4 sm:$0xff]  }
  0x62   :  { %708 = vmatpush1.bf16.msra.mxu1 %v1585_v34  ;;  %731 = vmatprep.mubr.bf16.mxu1 %v89_v2  ;;  %v1572_v11 = vld [vmem:[#allocation5 + $0x244] ss:$8 sps:$4 sm:$0xff]   ;;  %v1639_v12 = vld [vmem:[#allocation5 + $0xd0] ss:$8 sps:$4 sm:$0xff]   ;;  %v1570_v14 = vld [vmem:[#allocation5 + $0x240] ss:$8 sps:$4 sm:$0xff]  }
  0x63   :  { %709 = vmatprep.subr.bf16.mxu1 %v1586_v35  ;;  %v1640_v13 = vld [vmem:[#allocation5 + $0xe4] ss:$8 sps:$4 sm:$0xff]   ;;  %v1646_v17 = vld [vmem:[#allocation5 + $0xf4] ss:$8 sps:$4 sm:$0xff]   ;;  %v1648_v20 = vld [vmem:[#allocation5 + $0xf0] ss:$8 sps:$4 sm:$0xff]  }
  0x64   :  { %753 = vmatpush1.bf16.msra.mxu0 %v1522_v15  ;;  %v1578_v15 = vld [vmem:[#allocation5 + $0x254] ss:$8 sps:$4 sm:$0xff]   ;;  %v81_v21 = vld [vmem:[#allocation2] sm:$0xff]  ;;  %v1655_v34 = vld [vmem:[#allocation7 + $0x20] ss:$8 sps:$4 sm:$0xff]  }
  0x65   :  { %754 = vmatprep.subr.bf16.mxu0 %v1523_v16  ;;  %v1645_v16 = vld [vmem:[#allocation5 + $0xe0] ss:$8 sps:$4 sm:$0xff]   ;;  %v1651_v23 = vld [vmem:[#allocation7 + $0x4] ss:$8 sps:$4 sm:$0xff]   ;;  %v88_v26 = vpack.c.bf16 %v81_v21, %v81_v21  ;;  %v1654_v27 = vld [vmem:[#allocation7 + $0x14] ss:$8 sps:$4 sm:$0xff]  }
  0x66   :  { %710 = vmatpush1.bf16.msra.mxu1 %v1591_v38  ;;  %v1582_v22 = vld [vmem:[#allocation5 + $0x260] ss:$8 sps:$4 sm:$0xff]   ;;  %v1657_v31 = vld [vmem:[#allocation7 + $0x24] ss:$8 sps:$4 sm:$0xff]   ;;  %v1660_v35 = vld [vmem:[#allocation7 + $0x34] ss:$8 sps:$4 sm:$0xff]  }
  0x67   :  { %711 = vmatprep.subr.bf16.mxu1 %v1592_v39  ;;  %v1652_v30 = vld [vmem:[#allocation7 + $0x10] ss:$8 sps:$4 sm:$0xff]   ;;  %v1663_v39 = vld [vmem:[#allocation7 + $0x44] ss:$8 sps:$4 sm:$0xff]   ;;  %v1632_v53 = vld [vmem:[#allocation5 + $0x2e4] ss:$8 sps:$4 sm:$0xff]  }
  0x68   :  { %755 = vmatpush1.bf16.msra.mxu0 %v1525_v18  ;;  %v1576_v18 = vld [vmem:[#allocation5 + $0x250] ss:$8 sps:$4 sm:$0xff]   ;;  %v1658_v38 = vld [vmem:[#allocation7 + $0x30] ss:$8 sps:$4 sm:$0xff]  }
  0x69   :  { %756 = vmatprep.subr.bf16.mxu0 %v1526_v19  ;;  %v1584_v19 = vld [vmem:[#allocation5 + $0x264] ss:$8 sps:$4 sm:$0xff]   ;;  %v1673_v58 = vld [vmem:[#allocation7 + $0x80] ss:$8 sps:$4 sm:$0xff]   ;;  %v1642_v2 = vld [vmem:[#allocation5 + $0x300] ss:$8 sps:$4 sm:$0xff]  }
  0x6a   :  { %712 = vmatpush1.bf16.msra.mxu1 %v1597_v42  ;;  %v1661_v42 = vld [vmem:[#allocation7 + $0x40] ss:$8 sps:$4 sm:$0xff]  }
  0x6b   :  { %713 = vmatprep.subr.bf16.mxu1 %v1598_v43  ;;  %v1666_v43 = vld [vmem:[#allocation7 + $0x54] ss:$8 sps:$4 sm:$0xff]  }
  0x6c   :  { %757 = vmatpush1.bf16.msra.mxu0 %v1528_v24  ;;  %v1590_v24 = vld [vmem:[#allocation5 + $0x274] ss:$8 sps:$4 sm:$0xff]  }
  0x6d   :  { %758 = vmatprep.subr.bf16.mxu0 %v1529_v25  ;;  %v1649_v25 = vld [vmem:[#allocation7] ss:$8 sps:$4 sm:$0xff]  }
  0x6e   :  { %714 = vmatpush1.bf16.msra.mxu1 %v1603_v46  ;;  %v1664_v46 = vld [vmem:[#allocation7 + $0x50] ss:$8 sps:$4 sm:$0xff]  }
  0x6f   :  { %715 = vmatprep.subr.bf16.mxu1 %v1604_v47  ;;  %v1669_v47 = vld [vmem:[#allocation7 + $0x64] ss:$8 sps:$4 sm:$0xff]  }
  0x70   :  { %759 = vmatpush1.bf16.msra.mxu0 %v1531_v28  ;;  %v1588_v28 = vld [vmem:[#allocation5 + $0x270] ss:$8 sps:$4 sm:$0xff]  }
  0x71   :  { %760 = vmatprep.subr.bf16.mxu0 %v1532_v29  ;;  %v1596_v29 = vld [vmem:[#allocation5 + $0x284] ss:$8 sps:$4 sm:$0xff]  }
  0x72   :  { %716 = vmatpush1.bf16.msra.mxu1 %v1609_v50  ;;  %v1667_v50 = vld [vmem:[#allocation7 + $0x60] ss:$8 sps:$4 sm:$0xff]  }
  0x73   :  { %717 = vmatprep.subr.bf16.mxu1 %v1610_v52  ;;  %v1624_v52 = vld [vmem:[#allocation5 + $0x2d0] ss:$8 sps:$4 sm:$0xff]  }
  0x74   :  { %761 = vmatpush1.bf16.msra.mxu0 %v1534_v32  ;;  %v1594_v32 = vld [vmem:[#allocation5 + $0x280] ss:$8 sps:$4 sm:$0xff]  }
  0x75   :  { %762 = vmatprep.subr.bf16.mxu0 %v1535_v33  ;;  %v1602_v33 = vld [vmem:[#allocation5 + $0x294] ss:$8 sps:$4 sm:$0xff]  }
  0x76   :  { %718 = vmatpush1.bf16.msra.mxu1 %v1615_v55  ;;  %v1675_v55 = vld [vmem:[#allocation7 + $0x84] ss:$8 sps:$4 sm:$0xff]  }
  0x77   :  { %719 = vmatprep.subr.bf16.mxu1 %v1616_v56  ;;  %v1630_v56 = vld [vmem:[#allocation5 + $0x2e0] ss:$8 sps:$4 sm:$0xff]  }
  0x78   :  { %763 = vmatpush1.bf16.msra.mxu0 %v1537_v36  ;;  %v1600_v36 = vld [vmem:[#allocation5 + $0x290] ss:$8 sps:$4 sm:$0xff]  }
  0x79   :  { %764 = vmatprep.subr.bf16.mxu0 %v1538_v37  ;;  %v1608_v37 = vld [vmem:[#allocation5 + $0x2a4] ss:$8 sps:$4 sm:$0xff]  }
  0x7a   :  { %720 = vmatpush1.bf16.msra.mxu1 %v1621_v62  ;;  %v1644_v62 = vld [vmem:[#allocation5 + $0x304] ss:$8 sps:$4 sm:$0xff]  }
  0x7b   :  { %721 = vmatprep.subr.bf16.mxu1 %v1622_v63  ;;  %v1676_v63 = vld [vmem:[#allocation7 + $0x90] ss:$8 sps:$4 sm:$0xff]  }
  0x7c   :  { %765 = vmatpush1.bf16.msra.mxu0 %v1540_v40  ;;  %v1606_v40 = vld [vmem:[#allocation5 + $0x2a0] ss:$8 sps:$4 sm:$0xff]  }
  0x7d   :  { %766 = vmatprep.subr.bf16.mxu0 %v1541_v41  ;;  %v1614_v41 = vld [vmem:[#allocation5 + $0x2b4] ss:$8 sps:$4 sm:$0xff]  }
  0x7e   :  { %722 = vmatpush1.bf16.msra.mxu1 %v1627_v4  ;;  %v1684_v4 = vld [vmem:[#allocation7 + $0xb4] ss:$8 sps:$4 sm:$0xff]  }
  0x7f   :  { %723 = vmatprep.subr.bf16.mxu1 %v1628_v5  ;;  %v1839_v5 = vmov 0  }
  0x80   :  { %767 = vmatpush1.bf16.msra.mxu0 %v1543_v44  ;;  %v1612_v44 = vld [vmem:[#allocation5 + $0x2b0] ss:$8 sps:$4 sm:$0xff]  }
  0x81   :  { %768 = vmatprep.subr.bf16.mxu0 %v1544_v45  ;;  %v1620_v45 = vld [vmem:[#allocation5 + $0x2c4] ss:$8 sps:$4 sm:$0xff]  }
  0x82   :  { %724 = vmatpush1.bf16.msra.mxu1 %v1633_v8  ;;  %v87_v8 = vld [vmem:[#allocation2 + $0x30] sm:$0xff] }
  0x83   :  { %725 = vmatprep.subr.bf16.mxu1 %v1634_v9  ;;  %v1685_v9 = vld [vmem:[#allocation7 + $0xc0] ss:$8 sps:$4 sm:$0xff]  }
  0x84   :  { %769 = vmatpush1.bf16.msra.mxu0 %v1546_v48  ;;  %v1618_v48 = vld [vmem:[#allocation5 + $0x2c0] ss:$8 sps:$4 sm:$0xff]  }
  0x85   :  { %770 = vmatprep.subr.bf16.mxu0 %v1547_v49  ;;  %v1626_v49 = vld [vmem:[#allocation5 + $0x2d4] ss:$8 sps:$4 sm:$0xff]  }
  0x86   :  { %726 = vmatpush1.bf16.msra.mxu1 %v1639_v12  ;;  %v1690_v12 = vld [vmem:[#allocation7 + $0xd4] ss:$8 sps:$4 sm:$0xff]  }
  0x87   :  { %727 = vmatprep.subr.bf16.mxu1 %v1640_v13  ;;  %v1693_v13 = vld [vmem:[#allocation7 + $0xe4] ss:$8 sps:$4 sm:$0xff]  }
  0x88   :  { %771 = vmatpush1.bf16.msra.mxu0 %v1549_v51  ;;  %v1672_v51 = vld [vmem:[#allocation7 + $0x74] ss:$8 sps:$4 sm:$0xff]  }
  0x89   :  { %781 = vmatprep.subr.bf16.mxu0 %v1552_v54  ;;  %v1670_v54 = vld [vmem:[#allocation7 + $0x70] ss:$8 sps:$4 sm:$0xff]  }
  0x8a   :  { %728 = vmatpush1.bf16.msra.mxu1 %v1645_v16  ;;  %v1694_v16 = vld [vmem:[#allocation7 + $0xf0] ss:$8 sps:$4 sm:$0xff]  }
  0x8b   :  { %773 = vmatmul.mubr.bf16.vlgmr.msra.gmra.mrb[0].mxu0 %v90_v57  ;;  %729 = vmatprep.subr.bf16.mxu1 %v1646_v17  ;;  %v1638_v57 = vld [vmem:[#allocation5 + $0x2f4] ss:$8 sps:$4 sm:$0xff]  }
  0x8c   :  { %782 = vmatpush1.bf16.msra.mxu0 %v1550_v59  ;;  %813 = vmatprep.mubr.bf16.mxu0 %v93_v60  ;;  %v1678_v59 = vld [vmem:[#allocation7 + $0x94] ss:$8 sps:$4 sm:$0xff]   ;;  %v1636_v60 = vld [vmem:[#allocation5 + $0x2f0] ss:$8 sps:$4 sm:$0xff]  }
  0x8d   :  { %783 = vmatprep.subr.bf16.mxu0 %v1555_v61  ;;  %v85_v61 = vld [vmem:[#allocation2 + $0x20] sm:$0xff]  ;;  %v1697_v17 = vld [vmem:[#allocation8 + $0x40] sm:$0xff]  }
  0x8e   :  { %730 = vmatpush1.bf16.msra.mxu1 %v1648_v20  ;;  %v92_v0 = vpack.c.bf16 %v85_v61, %v85_v61 }
  0x8f   :  { %1071 = vmatprep.subr.bf16.mxu1 %v1651_v23 }
  0x90   :  { %784 = vmatpush1.bf16.msra.mxu0 %v1553_v1  ;;  %v1681_v1 = vld [vmem:[#allocation7 + $0xa4] ss:$8 sps:$4 sm:$0xff]  }
  0x91   :  { %785 = vmatprep.subr.bf16.mxu0 %v1560_v3  ;;  %732 = vmatmul.mubr.bf16.vlgmr.msra.gmra.mrb[0].mxu1 %v88_v26  ;;  %v1679_v3 = vld [vmem:[#allocation7 + $0xa0] ss:$8 sps:$4 sm:$0xff]  }
  0x92   :  { %1072 = vmatpush1.bf16.msra.mxu1 %v1649_v25  ;;  %v193_v25 = vld [vmem:[%s1958_s2] sm:$0x3] }
  0x93   :  { %1073 = vmatprep.subr.bf16.mxu1 %v1654_v27 }
  0x94   :  { %786 = vmatpush1.bf16.msra.mxu0 %v1558_v6  ;;  %v1682_v6 = vld [vmem:[#allocation7 + $0xb0] ss:$8 sps:$4 sm:$0xff]  }
  0x95   :  { %787 = vmatprep.subr.bf16.mxu0 %v1566_v7  ;;  %v1687_v7 = vld [vmem:[#allocation7 + $0xc4] ss:$8 sps:$4 sm:$0xff]  }
  0x96   :  { %1074 = vmatpush1.bf16.msra.mxu1 %v1652_v30 }
  0x97   :  { %1075 = vmatprep.subr.bf16.mxu1 %v1657_v31 }
  0x98   :  { %788 = vmatpush1.bf16.msra.mxu0 %v1564_v10  ;;  %v94_v10 = vpack.c.bf16 %v87_v8, %v87_v8 }
  0x99   :  { %789 = vmatprep.subr.bf16.mxu0 %v1572_v11  ;;  %v1688_v11 = vld [vmem:[#allocation7 + $0xd0] ss:$8 sps:$4 sm:$0xff]  }
  0x9a   :  { %1076 = vmatpush1.bf16.msra.mxu1 %v1655_v34 }
  0x9b   :  { %1077 = vmatprep.subr.bf16.mxu1 %v1660_v35 }
  0x9c   :  { %790 = vmatpush1.bf16.msra.mxu0 %v1570_v14  ;;  %v1691_v14 = vld [vmem:[#allocation7 + $0xe0] ss:$8 sps:$4 sm:$0xff]  }
  0x9d   :  { %791 = vmatprep.subr.bf16.mxu0 %v1578_v15  ;;  %v1696_v15 = vld [vmem:[#allocation7 + $0xf4] ss:$8 sps:$4 sm:$0xff]  }
  0x9e   :  { %1078 = vmatpush1.bf16.msra.mxu1 %v1658_v38 }
  0x9f   :  { %1079 = vmatprep.subr.bf16.mxu1 %v1663_v39 }
  0xa0   :  { %792 = vmatpush1.bf16.msra.mxu0 %v1576_v18 }
  0xa1   :  { %793 = vmatprep.subr.bf16.mxu0 %v1584_v19 }
  0xa2   :  { %1080 = vmatpush1.bf16.msra.mxu1 %v1661_v42  ;;  %v1699_v42 = vld [vmem:[#allocation8 + $0x48] sm:$0xff]  }
  0xa3   :  { %1081 = vmatprep.subr.bf16.mxu1 %v1666_v43  ;;  %v1700_v43 = vld [vmem:[#allocation8 + $0x8] sm:$0xff]  }
  0xa4   :  { %794 = vmatpush1.bf16.msra.mxu0 %v1582_v22  ;;  %v195_v22 = vlaneseq }
  0xa5   :  { %795 = vmatprep.subr.bf16.mxu0 %v1590_v24 }
  0xa6   :  { %1082 = vmatpush1.bf16.msra.mxu1 %v1664_v46  ;;  %v196_v23 = vshrl.u32 %v195_v22, 7  ;;  %v1703_v46 = vld [vmem:[#allocation8 + $0x58] sm:$0xff]  }
  0xa7   :  { %1083 = vmatprep.subr.bf16.mxu1 %v1669_v47  ;;  %v1704_v47 = vld [vmem:[#allocation8 + $0x18] sm:$0xff]  }
  0xa8   :  { %796 = vmatpush1.bf16.msra.mxu0 %v1588_v28  ;;  %v197_v24 = vsub.s32 0, %v196_v23  ;;  %v201_v26 = vsub.s32 1, %v196_v23 }
  0xa9   :  { %797 = vmatprep.subr.bf16.mxu0 %v1596_v29 }
  0xaa   :  { %1084 = vmatpush1.bf16.msra.mxu1 %v1667_v50  ;;  %v198_v27 = vrot.slane %v193_v25, %v197_v24  ;;  %v202_v28 = vrot.slane %v193_v25, %v201_v26  ;;  %v1707_v50 = vld [vmem:[#allocation8 + $0x68] sm:$0xff]  }
  0xab   :  { %1085 = vmatprep.subr.bf16.mxu1 %v1672_v51  ;;  %v1708_v51 = vld [vmem:[#allocation8 + $0x28] sm:$0xff]  }
  0xac   :  { %798 = vmatpush1.bf16.msra.mxu0 %v1594_v32 }
  0xad   :  { %799 = vmatprep.subr.bf16.mxu0 %v1602_v33 }
  0xae   :  { %1086 = vmatpush1.bf16.msra.mxu1 %v1670_v54  ;;  %v1711_v54 = vld [vmem:[#allocation8 + $0x78] sm:$0xff]  }
  0xaf   :  { %1087 = vmatprep.subr.bf16.mxu1 %v1675_v55  ;;  %v1712_v55 = vld [vmem:[#allocation8 + $0x38] sm:$0xff]  }
  0xb0   :  { %800 = vmatpush1.bf16.msra.mxu0 %v1600_v36 }
  0xb1   :  { %801 = vmatprep.subr.bf16.mxu0 %v1608_v37 }
  0xb2   :  { %1088 = vmatpush1.bf16.msra.mxu1 %v1673_v58 }
  0xb3   :  { %1089 = vmatprep.subr.bf16.mxu1 %v1678_v59 }
  0xb4   :  { %802 = vmatpush1.bf16.msra.mxu0 %v1606_v40  ;;  %v1698_v40 = vld [vmem:[#allocation8] sm:$0xff]  }
  0xb5   :  { %803 = vmatprep.subr.bf16.mxu0 %v1614_v41 }
  0xb6   :  { %1090 = vmatpush1.bf16.msra.mxu1 %v1676_v63 }
  0xb7   :  { %1091 = vmatprep.subr.bf16.mxu1 %v1681_v1 }
  0xb8   :  { %804 = vmatpush1.bf16.msra.mxu0 %v1612_v44  ;;  %v1701_v44 = vld [vmem:[#allocation8 + $0x50] sm:$0xff]  }
  0xb9   :  { %805 = vmatprep.subr.bf16.mxu0 %v1620_v45  ;;  %v1702_v45 = vld [vmem:[#allocation8 + $0x10] sm:$0xff]  }
  0xba   :  { %1092 = vmatpush1.bf16.msra.mxu1 %v1679_v3 }
  0xbb   :  { %1093 = vmatprep.subr.bf16.mxu1 %v1684_v4 }
  0xbc   :  { %806 = vmatpush1.bf16.msra.mxu0 %v1618_v48  ;;  %v1705_v48 = vld [vmem:[#allocation8 + $0x60] sm:$0xff]  }
  0xbd   :  { %807 = vmatprep.subr.bf16.mxu0 %v1626_v49  ;;  %v1706_v49 = vld [vmem:[#allocation8 + $0x20] sm:$0xff]  }
  0xbe   :  { %1094 = vmatpush1.bf16.msra.mxu1 %v1682_v6  ;;  %v1441_v6 = vld [vmem:[%s1962_s6] ss:$0 sm:$0xff] }
  0xbf   :  { %1095 = vmatprep.subr.bf16.mxu1 %v1687_v7 }
  0xc0   :  { %808 = vmatpush1.bf16.msra.mxu0 %v1624_v52  ;;  %v1709_v52 = vld [vmem:[#allocation8 + $0x70] sm:$0xff]  }
  0xc1   :  { %809 = vmatprep.subr.bf16.mxu0 %v1632_v53  ;;  %v1710_v53 = vld [vmem:[#allocation8 + $0x30] sm:$0xff]  }
  0xc2   :  { %1096 = vmatpush1.bf16.msra.mxu1 %v1685_v9 }
  0xc3   :  { %1097 = vmatprep.subr.bf16.mxu1 %v1690_v12 }
  0xc4   :  { %810 = vmatpush1.bf16.msra.mxu0 %v1630_v56  ;;  %v899_v56 = vld [vmem:[%s1960_s4] sm:$0x3]  ;;  %s1840_s4 = smov [#allocation10]  }
  0xc5   :  { %811 = vmatprep.subr.bf16.mxu0 %v1638_v57  ;;  %v904_v57 = vrot.slane %v899_v56, %v197_v24  ;;  %v908_v58 = vrot.slane %v899_v56, %v201_v26  ;;  %s1299_s30 = sshll.u32 %s1840_s4, 4  ;;  %s1300_s30 = int_to_ptr.vmem [resolvable:$true] %s1299_s30 }
  0xc6   :  { %1098 = vmatpush1.bf16.msra.mxu1 %v1688_v11  ;;  %s1801_s8 = scalar_lea.vmem %s1300_s30, 128  ;;  %p1806_p5 = scmp.lt.s32.totalorder %s1300_s30, %s1300_s30 }
  0xc7   :  { %1099 = vmatprep.subr.bf16.mxu1 %v1693_v13  ;;  %p1802_p4 = scmp.ne.s32.totalorder %s1300_s30, %s1801_s8  ;;  %p1807_p6 = scmp.lt.s32.totalorder %s1801_s8, %s1801_s8 }
  0xc8   :  { %812 = vmatpush1.bf16.msra.mxu0 %v1636_v60 }
  0xc9   :  { %822 = vmatprep.subr.bf16.mxu0 %v1644_v62  ;;  %p1808_p7 = por %p1807_p6, %p1806_p5 }
  0xca   :  { %1100 = vmatpush1.bf16.msra.mxu1 %v1691_v14 }
  0xcb   :  { %814 = vmatmul.mubr.bf16.vlgmr.msra.gmra.mrb[0].mxu0 %v92_v0  ;;  %1101 = vmatprep.subr.bf16.mxu1 %v1696_v15  ;;  %p1809_p8 = pnand %p1808_p7, %p1802_p4 }
  0xcc   :  { %823 = vmatpush1.bf16.msra.mxu0 %v1642_v2  ;;  %854 = vmatprep.mubr.bf16.mxu0 %v1839_v5 }
  0xce   :  { %1102 = vmatpush1.bf16.msra.mxu1 %v1694_v16 }
  0xcf   :  { %1458 = vmatprep.subr.bf16.mxu1 %v1697_v17 }
  0xd7   :  { %1408 = vmatmul.mubr.msk.bf16.vlgmr.msra.gmra.mrb[0].mxu0 %vm695_vm0, %v94_v10 }
 0x164   :  { %v733_v18 = vpop.f32.mrb[0].mxu1 }
 0x165   :  { %v735_v19 = vpop.f32.mrb[1].mxu1  ;;  %v734_v29 = vadd.f32 %v733_v18, %v198_v27 }
 0x166   :  { %v737_v20 = vpop.f32.mrb[2].mxu1  ;;  %v736_v30 = vadd.f32 %v735_v19, %v202_v28 }
 0x167   :  { %v738_v21 = vpop.f32.mrb[3].mxu1 }
 0x1aa   :  { %v856_v31 = vpop.f32.mrb[0].mxu0 }
 0x1ab   :  { %v1481_v32 = vadd.f32 %v856_v31, %v734_v29  ;;  %v858_v33 = vpop.f32.mrb[1].mxu0 }
 0x1ac   :  { %v1483_v34 = vadd.f32 %v858_v33, %v736_v30  ;;  %v860_v35 = vpop.f32.mrb[2].mxu0 }
 0x1ad   :  { %v863_v36 = vmax.f32 %v1481_v32, 0.0  ;;  %v861_v37 = vpop.f32.mrb[3].mxu0 }
 0x1ae   :  { %v864_v38 = vmax.f32 %v1483_v34, 0.0 }
 0x1af   :  { %v865_v41 = vpack.c.bf16 %v863_v36, %v863_v36 }
 0x1b0   :  { %v866_v39 = vpack.c.bf16 %v864_v38, %v864_v38 }
 0x1b2   :  { %1103 = vmatprep.mubr.bf16.mxu1 %v866_v39 }
 0x1b3   :  { %1104 = vmatmul.mubr.bf16.vlgmr.msra.gmra.mrb[4].mxu1 %v865_v41 }
 0x1b4   :  { %1459 = vmatpush3.bf16.msra.mxu1 %v1698_v40 }
 0x1b5   :  { %1460 = vmatprep.subr.bf16.mxu1 %v1699_v42 }
 0x1b8   :  { %1461 = vmatpush3.bf16.msra.mxu1 %v1700_v43 }
 0x1b9   :  { %1462 = vmatprep.subr.bf16.mxu1 %v1701_v44 }
 0x1bc   :  { %1463 = vmatpush3.bf16.msra.mxu1 %v1702_v45 }
 0x1bd   :  { %1464 = vmatprep.subr.bf16.mxu1 %v1703_v46 }
 0x1c0   :  { %1465 = vmatpush3.bf16.msra.mxu1 %v1704_v47 }
 0x1c1   :  { %1466 = vmatprep.subr.bf16.mxu1 %v1705_v48 }
 0x1c4   :  { %1467 = vmatpush3.bf16.msra.mxu1 %v1706_v49 }
 0x1c5   :  { %1468 = vmatprep.subr.bf16.mxu1 %v1707_v50 }
 0x1c8   :  { %1469 = vmatpush3.bf16.msra.mxu1 %v1708_v51 }
 0x1c9   :  { %1470 = vmatprep.subr.bf16.mxu1 %v1709_v52 }
 0x1cc   :  { %1471 = vmatpush3.bf16.msra.mxu1 %v1710_v53 }
 0x1cd   :  { %1472 = vmatprep.subr.bf16.mxu1 %v1711_v54 }
 0x1d0   :  { %1473 = vmatpush3.bf16.msra.mxu1 %v1712_v55 }
 0x286   :  { %v1105_v59 = vpop.f32.mrb[4].mxu1 }
 0x287   :  { %v1106_v60 = vadd.f32 %v1105_v59, %v904_v57  ;;  %v1107_v61 = vpop.f32.mrb[5].mxu1 }
 0x288   :  { %v1108_v62 = vadd.f32 %v1107_v61, %v908_v58  ;;  %v1109_v63 = vpop.f32.mrb[6].mxu1 }
 0x289   :  { %v1112_v0 = vmax.f32 %v1106_v60, 0.0  ;;  %v1110_v1 = vpop.f32.mrb[7].mxu1 }
 0x28a   :  { %v1113_v2 = vmax.f32 %v1108_v62, 0.0 }
 0x28b   :  { %v1114_v4 = vpack.c.bf16 %v1112_v0, %v1112_v0 }
 0x28c   :  { %v1115_v3 = vpack.c.bf16 %v1113_v2, %v1113_v2 }
 0x28e   :  { %1283 = vmatprep.mubr.bf16.mxu1 %v1115_v3 }
 0x28f   :  { %1284 = vmatmul.mubr.bf16.vlgmr.msra.gmra.mrb[8].mxu1 %v1114_v4 }
 0x362   :  { %v1474_v5 = vpop.f32.mrb[8].mxu1 }
 0x363   :  { %v1475_v7 = vpop.f32.mrb[9].mxu1 }
 0x364   :  { %v1476_v8 = vadd.f32 %v1475_v7, %v1474_v5  ;;  %v1477_v9 = vpop.f32.mrb[10].mxu1 }
 0x365   :  { %v1478_v10 = vpop.f32.mrb[11].mxu1 }
 0x366   :  { %v1286_v11 = vadd.f32 %v1476_v8, %v1441_v6 }
 0x368   :  { %1292 = vst.msk [vmem:[#allocation10] sm:$0xff] %vm1291_vm1, %v1286_v11 }
 0x369   :  { %1812 = shalt.err (!%p1809_p8)
}
 0x36a   :  { %s1813_s6 = scalar_lea.hbm %s1963_s7, 128 }
 0x36b   :  { %p1814_p9 = scmp.ne.s32.totalorder %s1963_s7, %s1813_s6  ;;  %p1817_p10 = scmp.lt.u32.totalorder %s1813_s6, %s1963_s7 }
 0x36d   :  { %p1819_p11 = pnand %p1817_p10, %p1814_p9 }
 0x36f   :  { %1822 = shalt.err (!%p1819_p11)
}
 0x370   :  { %1302 = dma.vmem_to_hbm [thread:$0]  %s1300_s30, 128, %s1963_s7, [#allocation4]  }
 0x371   :  { %1829 = dma.done.wait [#allocation4], 128  }
 0x372   :  { %1830 = vsyncadd [#allocation4], 4294967168 }
 0x373   :  { %1306 = vsyncpa [#allocation3], 1 }
 0x374   :  { %1307 = vsyncpa [#allocation6], 1 }
 0x375   :  { %1308 = vsyncpa [#allocation9], 1 }
 0x376   :  { %1309 = vsyncpa [#allocation4], 1 }

</bundles_post_ra>
